<compile_context>
chip_gen: v7x
topology: tpu7x:2x2x1
jax: 0.10.0
libtpu: 0.0.40
codegen_flags: <defaults>
</compile_context>

<pallas_src>
import functools

import jax
import jax.numpy as jnp
from jax.experimental import pallas as pl
from jax.experimental.pallas import tpu as pltpu

# asymmetric 8-bit (MinMaxObserver with symmetric=False)
BIT = 8
QUANT_MIN = 0
QUANT_MAX = (1 << BIT) - 1  # 255
EPS = float(jnp.finfo(jnp.float32).eps)  # torch.finfo(torch.float32).eps

# Minimum number of grid steps (when the input has enough rows) so the "parallel"
# row axis can shard across both TensorCores on v7x.  No effect on v5e/v6e (1 TC).
MIN_GRID_STEPS = 2


def _min_sublane_multiple(dtype) -> int:
    # f32 -> 8, bf16/f16 -> 16, int8/fp8 -> 32 (sublane packing rule).
    itemsize = jnp.dtype(dtype).itemsize
    return max(8, 32 // itemsize)


def _generation_params():
    """Best-effort (target_tile_bytes, vmem_limit_bytes) per TPU generation.

    v5e: 16 MiB scoped-VMEM default -> 2 MiB tiles (double-buffered in+out ~= 8 MiB).
    v6e: 128 MiB VMEM / 32 MiB scoped default -> 8 MiB tiles, raise limit to 48 MiB.
    v7x: 64 MiB VMEM per TC -> 4 MiB tiles, 32 MiB limit.
    Unknown chips: conservative 2 MiB tiles, compiler-default limit.
    """
    tile, limit = 2 << 20, None
    try:
        kind = jax.devices()[0].device_kind.lower()
    except Exception:  # pragma: no cover - CPU interpret / exotic backends
        kind = ""
    if "v7" in kind:
        tile, limit = 4 << 20, 32 << 20
    elif "v6" in kind or "trillium" in kind:
        tile, limit = 8 << 20, 48 << 20
    elif "v5" in kind:
        tile, limit = 2 << 20, 16 << 20
    return tile, limit


def _group_fake_quant_kernel(x_ref, o_ref, *, quant_min, quant_max, eps):
    # x_ref: (rows_per_block, group_size) tile in VMEM; each row is one quant group.
    q_range = float(quant_max - quant_min)

    # --- MinMaxObserver (per row == per channel along ch_axis=0 of the 2-D view) ---
    # min/max are exact element selection -> run on the native (possibly packed bf16)
    # dtype, upcast only the lane-sparse (R,1) stats.
    xr = x_ref[...]
    row_min = jnp.min(xr, axis=-1, keepdims=True).astype(jnp.float32)
    row_max = jnp.max(xr, axis=-1, keepdims=True).astype(jnp.float32)
    min_neg = jnp.minimum(row_min, 0.0)
    max_pos = jnp.maximum(row_max, 0.0)

    # --- calculate_qparams (asymmetric affine), zero_point folded into bounds ---
    scale = jnp.maximum((max_pos - min_neg) * (1.0 / q_range), eps)
    inv_scale = 1.0 / scale  # exact per-row reciprocal (hoisted out of the element pass)

    #   zp = clip(qmin - round(min_neg/scale), qmin, qmax)
    #   lo = qmin - zp = clip(round(min_neg/scale), -(qmax-qmin), 0)
    #   hi = qmax - zp = lo + (qmax - qmin)
    lo = jnp.clip(jnp.round(min_neg * inv_scale), -q_range, 0.0)
    hi = lo + q_range

    # --- fake_quantize_per_channel_affine, folded form ---
    #   out = clip(round(x/scale), lo, hi) * scale   ==   (clip(round(x/s)+zp) - zp)*s
    # x_ref is re-read here so the (bf16 -> f32) upcast fuses per vreg instead of
    # materializing a full-tile f32 copy.
    xf = x_ref[...].astype(jnp.float32)
    o_ref[...] = (jnp.clip(jnp.round(xf * inv_scale), lo, hi) * scale).astype(o_ref.dtype)


def group_fixed_fake_quantize(x, *, group_size=128, rows_per_block=None,
                              fake_quant_enabled=True, observer_enabled=True,
                              input_buffer_count=None):
    """Pallas implementation of GroupFixedFakeQuantize.forward."""
    if not fake_quant_enabled and not observer_enabled:
        return x
    if not fake_quant_enabled:
        # Observer-only path: output is unchanged.
        # TODO(synk): running min/max observer state (min_val/max_val buffers) is not materialized.
        return x

    org_shape = x.shape
    assert org_shape[-1] % group_size == 0, "last dim must be divisible by group_size"
    # NOTE: group_size == 128 (module default) gives a lane-exact block; group sizes
    # that are not multiples of 128 still work (full-extent last dim) but hit masked
    # partial stores — keep 128-aligned groups for performance.

    x2d = x.reshape(-1, group_size)
    n_rows = x2d.shape[0]
    itemsize = jnp.dtype(x.dtype).itemsize

    sub = _min_sublane_multiple(x.dtype)
    target_tile_bytes, vmem_limit = _generation_params()

    if rows_per_block is None:
        row_bytes = group_size * itemsize
        rows_per_block = max(sub, (target_tile_bytes // row_bytes) // sub * sub)
        # Guarantee >= MIN_GRID_STEPS grid steps when the input is big enough so the
        # "parallel" axis can shard across both v7x TensorCores.
        if n_rows >= MIN_GRID_STEPS * sub:
            cap = -(-(-(-n_rows // MIN_GRID_STEPS)) // sub) * sub  # round_up(cdiv(n,steps), sub)
            rows_per_block = min(rows_per_block, max(sub, cap))
    if rows_per_block > n_rows:
        # Full-extent block along the rows axis is always a legal tiling.
        rows_per_block = n_rows
    assert rows_per_block == n_rows or rows_per_block % sub == 0, (
        f"rows_per_block must be a multiple of {sub} for dtype {x.dtype} "
        f"(or equal the total number of rows)")

    grid = (pl.cdiv(n_rows, rows_per_block),)  # partial last block is fine: rows independent

    kernel = functools.partial(
        _group_fake_quant_kernel,
        quant_min=QUANT_MIN, quant_max=QUANT_MAX, eps=EPS,
    )

    block = (rows_per_block, group_size)
    if input_buffer_count is None:
        in_spec = pl.BlockSpec(block, lambda i: (i, 0))
    else:
        # Optional deeper input buffering (sweep on v7x if DMA is exposed).
        in_spec = pl.BlockSpec(block, lambda i: (i, 0),
                               pipeline_mode=pl.Buffered(input_buffer_count))

    n_elem = n_rows * group_size
    cost = pl.CostEstimate(
        flops=5 * n_elem,                 # mul, round, clip(x2), mul per element
        transcendentals=0,
        bytes_accessed=2 * n_elem * itemsize,  # HBM-streaming: read + write
    )

    out2d = pl.pallas_call(
        kernel,
        out_shape=jax.ShapeDtypeStruct((n_rows, group_size), x.dtype),
        grid_spec=pltpu.PrefetchScalarGridSpec(
            num_scalar_prefetch=0,
            grid=grid,
            in_specs=[in_spec],
            out_specs=pl.BlockSpec(block, lambda i: (i, 0)),
        ),
        compiler_params=pltpu.CompilerParams(
            dimension_semantics=("parallel",),   # rows independent -> megacore sharding
            vmem_limit_bytes=vmem_limit,
        ),
        cost_estimate=cost,
    )(x2d)

    return out2d.reshape(org_shape)


def _reference(x, group_size=128):
    """Pure-JAX reference matching the PyTorch forward (division form)."""
    org_shape = x.shape
    x2d = x.reshape(-1, group_size).astype(jnp.float32)
    min_neg = jnp.minimum(jnp.min(x2d, axis=-1, keepdims=True), 0.0)
    max_pos = jnp.maximum(jnp.max(x2d, axis=-1, keepdims=True), 0.0)
    scale = jnp.maximum((max_pos - min_neg) / float(QUANT_MAX - QUANT_MIN), EPS)
    zp = jnp.clip(QUANT_MIN - jnp.round(min_neg / scale), QUANT_MIN, QUANT_MAX)
    xq = jnp.clip(jnp.round(x2d / scale) + zp, QUANT_MIN, QUANT_MAX)
    ref = ((xq - zp) * scale).astype(x.dtype).reshape(org_shape)
    return ref, scale


def _check(out, ref, scale, group_size, atol_extra):
    # The kernel uses x * (1/scale); the PyTorch reference uses x / scale. These can
    # differ by at most one quantization step (one LSB) at rounding ties, so the
    # tolerance is one per-row scale plus dtype rounding slack.
    o = out.reshape(-1, group_size).astype(jnp.float32)
    r = ref.reshape(-1, group_size).astype(jnp.float32)
    tol = scale + atol_extra
    diff = jnp.abs(o - r)
    assert bool(jnp.all(diff <= tol)), f"max diff {float(jnp.max(diff))}"


if __name__ == "__main__":
    key = jax.random.PRNGKey(0)
    k1, k2 = jax.random.split(key)

    # Activation-like input: (batch=2, seq=8, hidden=256), group_size=128 (module default).
    x = jax.random.normal(k1, (2, 8, 256), dtype=jnp.float32) * 3.0
    out = jax.block_until_ready(group_fixed_fake_quantize(x, group_size=128))
    assert out.shape == x.shape and out.dtype == x.dtype
    ref, scale = _reference(x, group_size=128)
    _check(out, ref, scale, 128, atol_extra=1e-5)

    # Multi-step grid with a partial last block (cdiv path): 80 rows, 32-row blocks.
    x2 = jax.random.normal(k2, (2, 40, 128), dtype=jnp.float32) * 2.0
    out2 = jax.block_until_ready(
        group_fixed_fake_quantize(x2, group_size=128, rows_per_block=32))
    ref2, scale2 = _reference(x2, group_size=128)
    _check(out2, ref2, scale2, 128, atol_extra=1e-5)

    # bf16 input (native-dtype reductions, dtype-dependent sublane multiple).
    xb = (jax.random.normal(k1, (2, 8, 256), dtype=jnp.float32) * 3.0).astype(jnp.bfloat16)
    outb = jax.block_until_ready(group_fixed_fake_quantize(xb, group_size=128))
    assert outb.shape == xb.shape and outb.dtype == xb.dtype
    refb, scaleb = _reference(xb, group_size=128)
    _check(outb, refb, scaleb, 128, atol_extra=0.1)

    print("KERNEL_OK")
</pallas_src>

<mosaic_0001>
module attributes {stable_mosaic.version = 11 : i64} {
  func.func @_group_fake_quant_kernel(%arg0: i32, %arg1: memref<16x128xf32, #tpu.memory_space<vmem>>, %arg2: memref<16x128xf32, #tpu.memory_space<vmem>>) attributes {dimension_semantics = [#tpu.dimension_semantics<parallel>], iteration_bounds = array<i64: 2>, scalar_prefetch = 0 : i64, scratch_operands = 0 : i64, tpu.core_type = #tpu.core_type<tc>, window_params = [{transform_indices = @transform_0, window_bounds = array<i64: 16, 128>}, {transform_indices = @transform_1, window_bounds = array<i64: 16, 128>}]} {
    %c0 = arith.constant 0 : index
    %c0_0 = arith.constant 0 : index
    %0 = vector.load %arg1[%c0, %c0_0] : memref<16x128xf32, #tpu.memory_space<vmem>>, vector<16x128xf32>
    %cst = arith.constant dense<0x7F800000> : vector<16xf32>
    %1 = vector.multi_reduction <minimumf>, %0, %cst [1] : vector<16x128xf32> to vector<16xf32>
    %2 = vector.shape_cast %1 : vector<16xf32> to vector<16x1xf32>
    %cst_1 = arith.constant dense<0xFF800000> : vector<16xf32>
    %3 = vector.multi_reduction <maximumf>, %0, %cst_1 [1] : vector<16x128xf32> to vector<16xf32>
    %4 = vector.shape_cast %3 : vector<16xf32> to vector<16x1xf32>
    %cst_2 = arith.constant 0.000000e+00 : f32
    %5 = vector.broadcast %cst_2 : f32 to vector<16x1xf32>
    %6 = arith.minimumf %2, %5 : vector<16x1xf32>
    %cst_3 = arith.constant 0.000000e+00 : f32
    %7 = vector.broadcast %cst_3 : f32 to vector<16x1xf32>
    %8 = arith.maximumf %4, %7 : vector<16x1xf32>
    %9 = arith.subf %8, %6 : vector<16x1xf32>
    %cst_4 = arith.constant 0.00392156886 : f32
    %10 = vector.broadcast %cst_4 : f32 to vector<16x1xf32>
    %11 = arith.mulf %9, %10 : vector<16x1xf32>
    %cst_5 = arith.constant 1.1920929E-7 : f32
    %12 = vector.broadcast %cst_5 : f32 to vector<16x1xf32>
    %13 = arith.maximumf %11, %12 : vector<16x1xf32>
    %cst_6 = arith.constant 1.000000e+00 : f32
    %14 = vector.broadcast %cst_6 : f32 to vector<16x1xf32>
    %15 = arith.divf %14, %13 : vector<16x1xf32>
    %16 = arith.mulf %6, %15 : vector<16x1xf32>
    %17 = math.roundeven %16 : vector<16x1xf32>
    %cst_7 = arith.constant -2.550000e+02 : f32
    %cst_8 = arith.constant 0.000000e+00 : f32
    %18 = vector.broadcast %cst_7 : f32 to vector<16x1xf32>
    %19 = arith.maximumf %18, %17 : vector<16x1xf32>
    %20 = vector.broadcast %cst_8 : f32 to vector<16x1xf32>
    %21 = arith.minimumf %20, %19 : vector<16x1xf32>
    %cst_9 = arith.constant 2.550000e+02 : f32
    %22 = vector.broadcast %cst_9 : f32 to vector<16x1xf32>
    %23 = arith.addf %21, %22 : vector<16x1xf32>
    %c0_10 = arith.constant 0 : index
    %c0_11 = arith.constant 0 : index
    %24 = vector.load %arg1[%c0_10, %c0_11] : memref<16x128xf32, #tpu.memory_space<vmem>>, vector<16x128xf32>
    %25 = vector.broadcast %15 : vector<16x1xf32> to vector<16x128xf32>
    %26 = arith.mulf %24, %25 : vector<16x128xf32>
    %27 = math.roundeven %26 : vector<16x128xf32>
    %28 = vector.broadcast %21 : vector<16x1xf32> to vector<16x128xf32>
    %29 = arith.maximumf %28, %27 : vector<16x128xf32>
    %30 = vector.broadcast %23 : vector<16x1xf32> to vector<16x128xf32>
    %31 = arith.minimumf %30, %29 : vector<16x128xf32>
    %32 = vector.broadcast %13 : vector<16x1xf32> to vector<16x128xf32>
    %33 = arith.mulf %31, %32 : vector<16x128xf32>
    %c0_12 = arith.constant 0 : index
    %c0_13 = arith.constant 0 : index
    %34 = vector.load %arg2[%c0_12, %c0_13] : memref<16x128xf32, #tpu.memory_space<vmem>>, vector<16x128xf32>
    tpu.vector_store %arg2[%c0_12, %c0_13], %33 {strides = array<i32>} : memref<16x128xf32, #tpu.memory_space<vmem>>, vector<16x128xf32>,
    return
  }
  func.func @transform_0(%arg0: i32) -> (i32, i32) {
    %c0_i32 = arith.constant 0 : i32
    %c0_i32_0 = arith.constant 0 : i32
    return %arg0, %c0_i32 : i32, i32
  }
  func.func @transform_1(%arg0: i32) -> (i32, i32) {
    %c0_i32 = arith.constant 0 : i32
    %c0_i32_0 = arith.constant 0 : i32
    return %arg0, %c0_i32 : i32, i32
  }
}

</mosaic_0001>

<bundles_post_ra>
// kernel: tpu_custom_call.1
= control target key start
LH: loop header
LB: loop body
LE: loop exit
PB: predicated region body
PF: predicated region fallthrough
CT: control target
= control target key end

     0   :  { %6 = vsyncpa [#allocation3], 0  ;;  %s624_s0 = inlined_call_operand.hbm [shape: f32[32,128], index: 0, kind: input, shape index: {}]   ;;  %s625_s1 = inlined_call_operand.hbm [shape: f32[32,128], index: 1, kind: output, shape index: {}]  }
   0x1   :  { %8 = vsyncpa [#allocation3 + $0x1], 0 }
   0x2   :  { %9 = vsyncpa [#allocation4], 0 }
   0x3   :  { %11 = vsyncpa [#allocation4 + $0x1], 0  ;;  %s458_s6 = smov 0   ;;  %s460_s7 = smov 0  }
   0x4   :  { %s462_s8 = smov 0   ;;  %s464_s9 = smov 0  }
   0x5 LB: > { %s479_s10 = sadd.s32 4294967295, %s440_s9   ;;  %s270_s11 = sadd.s32 4294967294, %s440_s9   ;;  %s440_s9 = sphi %s464_s9, %s638_s9   ;;  %s436_s8 = sphi %s462_s8, %s637_s8   ;;  %s432_s7 = sphi %s460_s7, %s636_s7   ;;  %s428_s6 = sphi %s458_s6, %s635_s6  }
   0x6   : > { %s483_s12 = sadd.s32 1, %s440_s9   ;;  %s24_s13 = sadd.s32 1, %s436_s8 }
   0x7   : > { %s21_s14 = ssub.s32 %s440_s9, %s483_s12  ;;  %p31_p0 = scmp.ne.s32.totalorder %s436_s8, %s432_s7 }
   0x8   : > { %p22_p1 = scmp.eq.s32.totalorder %s21_s14, 0  ;;  %p32_p2 = scmp.eq.s32.totalorder %s440_s9, 0 }
   0x9   : > { %p37_p3 = scmp.ne.s32.totalorder %s432_s7, %s428_s6  ;;  %p38_p4 = scmp.eq.s32.totalorder %s479_s10, 0 }
   0xa   : > { %s495_s15 = scalar_select %p22_p1, %s436_s8, %s24_s13  }
   0xb   : > { %p497_p5 = por %p32_p2, %p31_p0  ;;  %p501_p6 = por %p38_p4, %p37_p3 }
   0xc   : > { %p61_p7 = scmp.eq.s32.totalorder %s479_s10, 1  ;;  %p67_p8 = scmp.eq.s32.totalorder %s270_s11, 1 }
   0xd   : > { %p302_p10 = scmp.lt.s32.totalorder %s440_s9, 2  ;;  %s87_s20 = sand.u32 1, %s436_s8  }
   0xe   : > { %p508_p11 = por %p61_p7, %p31_p0  ;;  %p512_p12 = por %p67_p8, %p37_p3 }
   0xf   : > { %s284_s21 = sshll.u32 %s440_s9, 8  ;;  %s273_s22 = sshll.u32 %s87_s20, 4 }
  0x10   : > { %s629_s18 = scalar_select %p508_p11, 1, 0 }
  0x11   : > { %s630_s19 = scalar_select %p512_p12, 1, 0 }
  0x12   : > { %s521_s25 = scalar_lea.hbm %s624_s0, %s284_s21  ;;  %s91_s26 = scalar_lea.vmem [#allocation2], %s273_s22 }
  0x13   : > { %s98_s27 = sshll.u32 %s91_s26, 4  ;;  %p525_p13 = pnand %p302_p10, %p497_p5  ;;  %s529_s27 = int_to_ptr.vmem [resolvable:$true] %s98_s27 }
  0x14   : > { %s531_s29 = scalar_lea.sflag [#allocation3], %s87_s20  ;;  %s344_s30 = scalar_lea.hbm %s521_s25, 256 }
  0x15   : > { %p345_p0 = scmp.ne.s32.totalorder %s521_s25, %s344_s30  ;;  %p346_p1 = pneg %p525_p13 }
  0x16   : > { %s349_s4 = scalar_lea.hbm %s624_s0, 512  ;;  %p350_p4 = scmp.lt.u32.totalorder %s521_s25, %s624_s0 }
  0x17   : > { %p347_p2 = pnand %p346_p1, %p345_p0  ;;  %p351_p5 = scmp.lt.u32.totalorder %s349_s4, %s344_s30 }
  0x18   : > { %p353_p8 = scmp.lt.u32.totalorder %s344_s30, %s521_s25 }
  0x19   : > { %p348_p3 = pneg %p347_p2  ;;  %p352_p7 = por %p351_p5, %p350_p4 }
  0x1b   : > { %p354_p10 = por %p353_p8, %p352_p7 }
  0x1d   : > { %p355_p9 = pnand %p354_p10, %p348_p3 }
  0x1f   : > { %358 = shalt.err (!%p355_p9)
}
  0x20   : > { %s359_s13 = scalar_lea.vmem %s529_s27, 256  ;;  %s442_s14 = smov [#allocation2]  }
  0x21   : > { %p360_p0 = scmp.ne.s32.totalorder %s529_s27, %s359_s13  ;;  %s364_s16 = sshll.u32 %s442_s14, 4  ;;  %s365_s16 = int_to_ptr.vmem [resolvable:$false] %s364_s16 }
  0x22   : > { %s366_s20 = scalar_lea.vmem %s365_s16, 512  ;;  %p367_p11 = scmp.lt.s32.totalorder %s529_s27, %s365_s16 }
  0x23   : > { %p362_p2 = pnand %p360_p0, %p346_p1  ;;  %p368_p4 = scmp.lt.s32.totalorder %s366_s20, %s359_s13 }
  0x25   : > { %p363_p12 = pneg %p362_p2  ;;  %p369_p5 = por %p368_p4, %p367_p11 }
  0x27   : > { %p370_p7 = pnand %p369_p5, %p363_p12 }
  0x29   : > { %373 = shalt.err (!%p370_p7)
}
  0x2a   : > { %s443_s21 = smov 128   ;;  %s444_s22 = smov 8  }
  0x2b   : > { %297 = dma.hbm_to_vmem [thread:$0]  (!%p525_p13), %s521_s25, 256, %s529_s27, %s531_s29, %s443_s21, %s443_s21, %s444_s22  }
  0x2c   : > { %p276_p9 = scmp.ge.s32.totalorder %s440_s9, 1  ;;  %p106_p1 = scmp.lt.s32.totalorder %s440_s9, 3 }
  0x2e   : > { %p107_p3 = pnand %p276_p9, %p106_p1 }
  0x2f   : > { %s562_s23 = sand.u32 (!%p107_p3), 1, %s432_s7  }
  0x30   : > { %110 = sbr.rel (%p107_p3) target bundleno = 251 (0xfb), region = 24  ;;  %s277_s24 = sshll.u32 (!%p107_p3), %s562_s23, 4 }
  0x31   : > { %s113_s26 = scalar_lea.sflag (!%p107_p3), [#allocation3], %s562_s23  ;;  %s116_s30 = scalar_lea.vmem (!%p107_p3), [#allocation2], %s277_s24 }
  0x37   : > { %419 = dma.done.wait (%p501_p6), %s113_s26, 256  }
  0x38   : > { %421 = vsyncadd (%p501_p6), %s113_s26, 4294967040  ;;  %v137_v0 = vld [vmem:[%s116_s30] sm:$0xff]  ;;  %v138_v1 = vld [vmem:[%s116_s30 + $0x8] sm:$0xff]  ;;  %s134_s17 = scalar_lea.vmem [#allocation5], %s277_s24  ;;  %s285_s27 = sshll.u32 %s479_s10, 8 }
  0x39   : > { %143 = vmax.xlane.f32.xlu1 %v137_v0  ;;  %139 = vmin.xlane.f32.xlu0 %v137_v0  ;;  %s197_s25 = sshll.u32 %s134_s17, 4  ;;  %s580_s2 = scalar_lea.hbm %s625_s1, %s285_s27  ;;  %s575_s25 = int_to_ptr.vmem [resolvable:$true] %s197_s25 }
  0x3a   : > { %s184_s3 = scalar_lea.sflag [#allocation4], %s562_s23  ;;  %s374_s4 = scalar_lea.vmem %s575_s25, 256 }
  0x3b   : > { %p375_p6 = scmp.ne.s32.totalorder %s575_s25, %s374_s4  ;;  %p632_p11 = scmp.ne.s32.totalorder %s629_s18, 0 }
  0x3c   : > { %s445_s10 = smov [#allocation5]  }
  0x3d   : > { %145 = vmax.xlane.f32.xlu1 %v138_v1  ;;  %141 = vmin.xlane.f32.xlu0 %v138_v1  ;;  %p376_p12 = pnand %p375_p6, %p632_p11  ;;  %s378_s5 = sshll.u32 %s445_s10, 4  ;;  %s379_s5 = int_to_ptr.vmem [resolvable:$false] %s378_s5 }
  0x3e   : > { %s380_s11 = scalar_lea.vmem %s379_s5, 512  ;;  %p381_p8 = scmp.lt.s32.totalorder %s575_s25, %s379_s5 }
  0x3f   : > { %p377_p13 = pneg %p376_p12  ;;  %p382_p10 = scmp.lt.s32.totalorder %s380_s11, %s374_s4 }
  0x41   : > { %p383_p0 = por %p382_p10, %p381_p8 }
  0x43   : > { %p384_p2 = pnand %p383_p0, %p377_p13 }
  0xc6   : > { %v144_v2 = vpop.xlane.xlu1 %143  ;;  %v140_v3 = vpop.xlane.xlu0 %139 }
  0xc7   : > { %v149_v4 = vmax.f32 %v144_v2, 0.0  ;;  %v147_v5 = vmin.f32 %v140_v3, 0.0 }
  0xc9   : > { %v151_v6 = vsub.f32 %v149_v4, %v147_v5 }
  0xca   : > { %v146_v7 = vpop.xlane.xlu1 %145  ;;  %v142_v8 = vpop.xlane.xlu0 %141 }
  0xcb   : > { %v153_v9 = vmul.f32 0.003921569, %v151_v6  ;;  %v150_v10 = vmax.f32 %v146_v7, 0.0  ;;  %v148_v11 = vmin.f32 %v142_v8, 0.0 }
  0xcd   : > { %v155_v12 = vmax.f32 %v153_v9, 1.1920929e-07  ;;  %v152_v13 = vsub.f32 %v150_v10, %v148_v11 }
  0xcf   : > { %340 = vrcp.f32 %v155_v12  ;;  %v154_v14 = vmul.f32 0.003921569, %v152_v13 }
  0xd1   : > { %v156_v15 = vmax.f32 %v154_v14, 1.1920929e-07 }
  0xd3   : > { %342 = vrcp.f32 %v156_v15 }
  0xd9   : > { %v341_v16 = vpop.eup %340 }
  0xda   : > { %v161_v17 = vmul.f32 %v341_v16, %v147_v5  ;;  %v171_v19 = vmul.f32 %v341_v16, %v137_v0 }
  0xdc   : > { %v286_v18 = vround.rtne.f32 %v161_v17  ;;  %v288_v24 = vround.rtne.f32 %v171_v19 }
  0xdd   : > { %v343_v20 = vpop.eup %342 }
  0xde   : > { %v165_v21 = vmax.f32 %v286_v18, -255.0  ;;  %v162_v22 = vmul.f32 %v343_v20, %v148_v11  ;;  %v172_v26 = vmul.f32 %v343_v20, %v138_v1 }
  0xe0   : > { %v167_v23 = vmin.f32 %v165_v21, 0.0  ;;  %v287_v25 = vround.rtne.f32 %v162_v22  ;;  %v289_v32 = vround.rtne.f32 %v172_v26 }
  0xe2   : > { %v169_v27 = vadd.f32 255.0, %v167_v23  ;;  %v175_v28 = vmax.f32 %v167_v23, %v288_v24  ;;  %v166_v29 = vmax.f32 %v287_v25, -255.0 }
  0xe4   : > { %v177_v30 = vmin.f32 %v169_v27, %v175_v28  ;;  %v168_v31 = vmin.f32 %v166_v29, 0.0 }
  0xe6   : > { %v179_v33 = vmul.f32 %v177_v30, %v155_v12  ;;  %v170_v34 = vadd.f32 255.0, %v168_v31  ;;  %v176_v35 = vmax.f32 %v168_v31, %v289_v32 }
  0xe8   : > { %181 = vst [vmem:[%s134_s17] sm:$0xff] %v179_v33  ;;  %v178_v36 = vmin.f32 %v170_v34, %v176_v35 }
  0xea   : > { %v180_v37 = vmul.f32 %v178_v36, %v156_v15 }
  0xec   : > { %182 = vst [vmem:[%s134_s17 + $0x8] sm:$0xff] %v180_v37 }
  0xed   : > { %387 = shalt.err (!%p384_p2)
}
  0xee   : > { %s388_s13 = scalar_lea.hbm %s580_s2, 256  ;;  %s392_s20 = scalar_lea.hbm %s625_s1, 512 }
  0xef   : > { %p389_p4 = scmp.ne.s32.totalorder %s580_s2, %s388_s13  ;;  %p393_p9 = scmp.lt.u32.totalorder %s580_s2, %s625_s1 }
  0xf0   : > { %p394_p1 = scmp.lt.u32.totalorder %s392_s20, %s388_s13  ;;  %p396_p6 = scmp.lt.u32.totalorder %s388_s13, %s580_s2 }
  0xf1   : > { %p390_p5 = pnand %p389_p4, %p632_p11 }
  0xf2   : > { %p395_p3 = por %p394_p1, %p393_p9 }
  0xf3   : > { %p391_p7 = pneg %p390_p5 }
  0xf4   : > { %p397_p12 = por %p396_p6, %p395_p3 }
  0xf6   : > { %p398_p13 = pnand %p397_p12, %p391_p7 }
  0xf8   : > { %401 = shalt.err (!%p398_p13)
}
  0xf9   : > { %s446_s24 = smov 128   ;;  %s447_s26 = smov 8  }
  0xfa   : > { %292 = dma.vmem_to_hbm [thread:$0]  (%p632_p11), %s575_s25, 256, %s580_s2, %s184_s3, %s446_s24, %s446_s24, %s447_s26  }
  0xfb PF: > { %s212_s30 = sand.u32 1, %s428_s6   ;;  %p633_p8 = scmp.ne.s32.totalorder %s630_s19, 0 }
  0xfc   : > { %p634_p10 = scmp.ge.s32.totalorder %s440_s9, 2  ;;  %s213_s17 = scalar_lea.sflag [#allocation4], %s212_s30 }
  0xfe   : > { %p299_p0 = pnand %p634_p10, %p633_p8 }
 0x100   : > { %423 = dma.done.wait (!%p299_p0), %s213_s17, 256  }
 0x101   : > { %425 = vsyncadd (!%p299_p0), %s213_s17, 4294967040  ;;  %p14_p2 = scmp.ge.s32.totalorder %s483_s12, 4   ;;  %s635_s6 = smov %s432_s7 }
 0x102   : > { %s636_s7 = smov %s436_s8  ;;  %s637_s8 = smov %s495_s15 }
 0x103   : > { %s638_s9 = smov %s483_s12  ;;  %16 = sbr.rel (!%p14_p2) target bundleno = 5 (0x5), region = 69 }
 0x10a   :  { %218 = vsyncpa [#allocation3], 1 }
 0x10b   :  { %220 = vsyncpa [#allocation3 + $0x1], 1 }
 0x10c   :  { %221 = vsyncpa [#allocation4], 1 }
 0x10d   :  { %223 = vsyncpa [#allocation4 + $0x1], 1 }

</bundles_post_ra>
